<compile_context>
chip_gen: v7x
topology: tpu7x:2x2x1
jax: 0.10.0
libtpu: 0.0.40
codegen_flags: <defaults>
</compile_context>

<pallas_src>
import functools

import jax
import jax.numpy as jnp
from jax.experimental import pallas as pl
from jax.experimental.pallas import tpu as pltpu


def _round_up(a: int, b: int) -> int:
    return (a + b - 1) // b * b


def _softplus_f32(x):
    # Numerically-stable softplus matching PyTorch semantics
    # (beta=1, threshold=20): x if x > 20 else log1p(exp(x)).
    return jnp.where(x > 20.0, x, jnp.log1p(jnp.exp(jnp.minimum(x, 20.0))))


def _gan_loss_gen_kernel(x_ref, o_ref, *, tm: int, m_rows: int,
                         blocks_per_core: int):
    p = pl.program_id(0)          # TensorCore-split axis ("parallel")
    i = pl.program_id(1)          # reduction axis ("arbitrary")

    @pl.when(i == 0)
    def _():
        o_ref[...] = jnp.zeros_like(o_ref)

    blk = p * blocks_per_core + i
    # Block-local validity limit: number of valid rows in this logical block.
    # <= 0 for whole blocks duplicated by the clamped index_map; in (0, tm)
    # for the ragged last row-block; >= tm for fully-valid blocks.
    rows_left = m_rows - blk * tm

    x = x_ref[...].astype(jnp.float32)
    sp = _softplus_f32(x)

    # Hot path: fully-valid block -> unmasked tree accumulation into the
    # (8, 128) resident output block (VALU adds only; cross-lane reduce is
    # deferred to the wrapper).
    @pl.when(rows_left >= tm)
    def _():
        o_ref[...] += jnp.sum(sp.reshape(tm // 8, 8, 128), axis=0)

    # Cold path: ragged last block or clamped/duplicated block -> mask on the
    # block-local row index (single iota; garbage past the array end --
    # including NaN/Inf -- is discarded by the select).
    @pl.when(rows_left < tm)
    def _():
        row = jax.lax.broadcasted_iota(jnp.int32, sp.shape, 0)
        sp_m = jnp.where(row < rows_left, sp, 0.0)
        o_ref[...] += jnp.sum(sp_m.reshape(tm // 8, 8, 128), axis=0)


def gan_loss_generator(discriminator_prediction_fake: jax.Array) -> jax.Array:
    """Scalar standard generator GAN loss: -mean(softplus(x))."""
    x = discriminator_prediction_fake.reshape(-1)      # native dtype, no upcast
    n = int(x.size)
    lane = 128

    # Ragged tail (<128 elements): fold in wrapper-side instead of padding the
    # whole array (avoids an extra full HBM pass for the common streaming case).
    rem = n % lane
    n_kern = n - rem
    tail_sum = jnp.float32(0.0)
    if rem:
        tail_sum = jnp.sum(_softplus_f32(x[n_kern:].astype(jnp.float32)))
        x = jax.lax.slice(x, (0,), (n_kern,))

    if n_kern == 0:
        return -(tail_sum / jnp.float32(n))

    x2 = x.reshape(-1, lane)                            # free reshape
    m = x2.shape[0]

    # Sublane multiple required by the packed layout of the input dtype.
    itemsize = jnp.dtype(x2.dtype).itemsize
    sub = {4: 8, 2: 16, 1: 32}.get(itemsize, 8)
    tm_max = 8192                    # 4 MiB f32 block; 8 MiB double-buffered
    tm = min(tm_max, _round_up(m, sub))

    nb = pl.cdiv(m, tm)              # total row-blocks
    n_cores = min(2, nb)             # no duplicated read for single-block inputs
    bpc = pl.cdiv(nb, n_cores)       # row-blocks per core

    out = pl.pallas_call(
        functools.partial(_gan_loss_gen_kernel, tm=tm, m_rows=m,
                          blocks_per_core=bpc),
        out_shape=jax.ShapeDtypeStruct((n_cores * 8, lane), jnp.float32),
        grid_spec=pltpu.PrefetchScalarGridSpec(
            num_scalar_prefetch=0,
            grid=(n_cores, bpc),
            in_specs=[pl.BlockSpec(
                (tm, lane),
                # Clamp so out-of-range (duplicated) tail blocks still read
                # valid memory; their contribution is zeroed by the cold-path
                # mask (rows_left <= 0 for those blocks).
                lambda p, i: (jnp.minimum(p * bpc + i, nb - 1), 0))],
            out_specs=pl.BlockSpec((8, lane), lambda p, i: (p, 0)),
        ),
        compiler_params=pltpu.CompilerParams(
            dimension_semantics=("parallel", "arbitrary"),
        ),
        cost_estimate=pl.CostEstimate(
            flops=5 * n_kern,
            transcendentals=2 * n_kern,
            bytes_accessed=n_kern * itemsize + n_cores * 8 * lane * 4,
        ),
    )(x2)

    # Final cross-lane reduce + tail + mean + negate (tiny wrapper-side op).
    return -((jnp.sum(out) + tail_sum) / jnp.float32(n))


if __name__ == "__main__":
    key = jax.random.PRNGKey(0)

    # Raw discriminator predictions for fake samples (patch-GAN logits), NCHW.
    pred_fake = jax.random.normal(key, (2, 4, 16, 16), dtype=jnp.float32) * 3.0
    loss = jax.block_until_ready(gan_loss_generator(pred_fake))
    ref = -jnp.mean(jax.nn.softplus(pred_fake))
    assert jnp.allclose(loss, ref, atol=1e-5, rtol=1e-5), (loss, ref)

    # Ragged case (size not a multiple of 128) exercises the masked cold path
    # and the wrapper-side tail fold.
    key2 = jax.random.PRNGKey(0)
    pred_ragged = jax.random.normal(key2, (3, 5, 7, 11), dtype=jnp.float32) * 3.0
    loss_r = jax.block_until_ready(gan_loss_generator(pred_ragged))
    ref_r = -jnp.mean(jax.nn.softplus(pred_ragged))
    assert jnp.allclose(loss_r, ref_r, atol=1e-5, rtol=1e-5), (loss_r, ref_r)

    print("KERNEL_OK")
</pallas_src>

<mosaic_0001>
module attributes {stable_mosaic.version = 11 : i64} {
  func.func @_gan_loss_gen_kernel(%arg0: i32, %arg1: i32, %arg2: memref<16x128xf32, #tpu.memory_space<vmem>>, %arg3: memref<8x128xf32, #tpu.memory_space<vmem>>) attributes {dimension_semantics = [#tpu.dimension_semantics<parallel>, #tpu.dimension_semantics<arbitrary>], iteration_bounds = array<i64: 1, 1>, scalar_prefetch = 0 : i64, scratch_operands = 0 : i64, tpu.core_type = #tpu.core_type<tc>, window_params = [{transform_indices = @transform_0, window_bounds = array<i64: 16, 128>}, {transform_indices = @transform_1, window_bounds = array<i64: 8, 128>}]} {
    %c0_i32 = arith.constant 0 : i32
    %0 = arith.cmpi eq, %arg1, %c0_i32 : i32
    %1 = arith.extui %0 : i1 to i32
    %c0_i32_0 = arith.constant 0 : i32
    %2 = arith.cmpi ne, %1, %c0_i32_0 : i32
    scf.if %2 {
      %cst_8 = arith.constant 0.000000e+00 : f32
      %21 = vector.broadcast %cst_8 : f32 to vector<8x128xf32>
      %c0_9 = arith.constant 0 : index
      %c0_10 = arith.constant 0 : index
      %22 = vector.load %arg3[%c0_9, %c0_10] : memref<8x128xf32, #tpu.memory_space<vmem>>, vector<8x128xf32>
      tpu.vector_store %arg3[%c0_9, %c0_10], %21 {strides = array<i32>} : memref<8x128xf32, #tpu.memory_space<vmem>>, vector<8x128xf32>,
    } else {
    }
    %c1_i32 = arith.constant 1 : i32
    %3 = arith.muli %arg0, %c1_i32 : i32
    %4 = arith.addi %3, %arg1 : i32
    %c16_i32 = arith.constant 16 : i32
    %5 = arith.muli %4, %c16_i32 : i32
    %c16_i32_1 = arith.constant 16 : i32
    %6 = arith.subi %c16_i32_1, %5 : i32
    %c0 = arith.constant 0 : index
    %c0_2 = arith.constant 0 : index
    %7 = vector.load %arg2[%c0, %c0_2] : memref<16x128xf32, #tpu.memory_space<vmem>>, vector<16x128xf32>
    %cst = arith.constant 2.000000e+01 : f32
    %8 = vector.broadcast %cst : f32 to vector<16x128xf32>
    %9 = arith.cmpf ogt, %7, %8 : vector<16x128xf32>
    %cst_3 = arith.constant 2.000000e+01 : f32
    %10 = vector.broadcast %cst_3 : f32 to vector<16x128xf32>
    %11 = arith.minimumf %7, %10 : vector<16x128xf32>
    %12 = math.exp %11 : vector<16x128xf32>
    %13 = math.log1p %12 : vector<16x128xf32>
    %14 = arith.select %9, %7, %13 : vector<16x128xi1>, vector<16x128xf32>
    %c16_i32_4 = arith.constant 16 : i32
    %15 = arith.cmpi sge, %6, %c16_i32_4 : i32
    %16 = arith.extui %15 : i1 to i32
    %c0_i32_5 = arith.constant 0 : i32
    %17 = arith.cmpi ne, %16, %c0_i32_5 : i32
    scf.if %17 {
      %c0_8 = arith.constant 0 : index
      %c0_9 = arith.constant 0 : index
      %21 = vector.load %arg3[%c0_8, %c0_9] : memref<8x128xf32, #tpu.memory_space<vmem>>, vector<8x128xf32>
      %22 = vector.shape_cast %14 : vector<16x128xf32> to vector<2x8x128xf32>
      %cst_10 = arith.constant dense<0.000000e+00> : vector<8x128xf32>
      %23 = vector.multi_reduction <add>, %22, %cst_10 [0] : vector<2x8x128xf32> to vector<8x128xf32>
      %24 = arith.addf %21, %23 : vector<8x128xf32>
      %c0_11 = arith.constant 0 : index
      %c0_12 = arith.constant 0 : index
      %25 = vector.load %arg3[%c0_11, %c0_12] : memref<8x128xf32, #tpu.memory_space<vmem>>, vector<8x128xf32>
      tpu.vector_store %arg3[%c0_11, %c0_12], %24 {strides = array<i32>} : memref<8x128xf32, #tpu.memory_space<vmem>>, vector<8x128xf32>,
    } else {
    }
    %c16_i32_6 = arith.constant 16 : i32
    %18 = arith.cmpi slt, %6, %c16_i32_6 : i32
    %19 = arith.extui %18 : i1 to i32
    %c0_i32_7 = arith.constant 0 : i32
    %20 = arith.cmpi ne, %19, %c0_i32_7 : i32
    scf.if %20 {
      %21 = tpu.iota {dimensions = array<i32: 0>} : vector<16x128xi32>
      %22 = vector.broadcast %6 : i32 to vector<16x128xi32>
      %23 = arith.cmpi slt, %21, %22 : vector<16x128xi32>
      %cst_8 = arith.constant 0.000000e+00 : f32
      %24 = vector.broadcast %cst_8 : f32 to vector<16x128xf32>
      %25 = arith.select %23, %14, %24 : vector<16x128xi1>, vector<16x128xf32>
      %c0_9 = arith.constant 0 : index
      %c0_10 = arith.constant 0 : index
      %26 = vector.load %arg3[%c0_9, %c0_10] : memref<8x128xf32, #tpu.memory_space<vmem>>, vector<8x128xf32>
      %27 = vector.shape_cast %25 : vector<16x128xf32> to vector<2x8x128xf32>
      %cst_11 = arith.constant dense<0.000000e+00> : vector<8x128xf32>
      %28 = vector.multi_reduction <add>, %27, %cst_11 [0] : vector<2x8x128xf32> to vector<8x128xf32>
      %29 = arith.addf %26, %28 : vector<8x128xf32>
      %c0_12 = arith.constant 0 : index
      %c0_13 = arith.constant 0 : index
      %30 = vector.load %arg3[%c0_12, %c0_13] : memref<8x128xf32, #tpu.memory_space<vmem>>, vector<8x128xf32>
      tpu.vector_store %arg3[%c0_12, %c0_13], %29 {strides = array<i32>} : memref<8x128xf32, #tpu.memory_space<vmem>>, vector<8x128xf32>,
    } else {
    }
    return
  }
  func.func @transform_0(%arg0: i32, %arg1: i32) -> (i32, i32) {
    %c1_i32 = arith.constant 1 : i32
    %0 = arith.muli %arg0, %c1_i32 : i32
    %1 = arith.addi %0, %arg1 : i32
    %c0_i32 = arith.constant 0 : i32
    %2 = arith.minsi %1, %c0_i32 : i32
    %c0_i32_0 = arith.constant 0 : i32
    %c0_i32_1 = arith.constant 0 : i32
    return %2, %c0_i32_0 : i32, i32
  }
  func.func @transform_1(%arg0: i32, %arg1: i32) -> (i32, i32) {
    %c0_i32 = arith.constant 0 : i32
    %c0_i32_0 = arith.constant 0 : i32
    return %arg0, %c0_i32 : i32, i32
  }
}

</mosaic_0001>

<bundles_post_ra>
// kernel: tpu_custom_call.1
= control target key start
LH: loop header
LB: loop body
LE: loop exit
PB: predicated region body
PF: predicated region fallthrough
CT: control target
= control target key end

     0   :  { %6 = vsyncpa [#allocation3], 0  ;;  %s211_s0 = inlined_call_operand.hbm [shape: f32[16,128], index: 0, kind: input, shape index: {}]   ;;  %s212_s1 = inlined_call_operand.hbm [shape: f32[8,128], index: 1, kind: output, shape index: {}]  }
   0x1   :  { %7 = vsyncpa [#allocation4], 0  ;;  %s173_s6 = smov [#allocation2]   ;;  %s125_s10 = scalar_lea.hbm %s211_s0, 256 }
   0x2   :  { %s19_s7 = sshll.u32 %s173_s6, 4  ;;  %p126_p0 = scmp.ne.s32.totalorder %s211_s0, %s125_s10  ;;  %s20_s7 = int_to_ptr.vmem [resolvable:$true] %s19_s7 }
   0x3   :  { %p129_p1 = scmp.lt.u32.totalorder %s125_s10, %s211_s0 }
   0x5   :  { %p131_p2 = pnand %p129_p1, %p126_p0 }
   0x7   :  { %134 = shalt.err (!%p131_p2)
}
   0x8   :  { %s135_s15 = scalar_lea.vmem %s20_s7, 256  ;;  %p140_p4 = scmp.lt.s32.totalorder %s20_s7, %s20_s7 }
   0x9   :  { %p136_p3 = scmp.ne.s32.totalorder %s20_s7, %s135_s15  ;;  %p141_p5 = scmp.lt.s32.totalorder %s135_s15, %s135_s15 }
   0xb   :  { %p142_p6 = por %p141_p5, %p140_p4 }
   0xd   :  { %p143_p7 = pnand %p142_p6, %p136_p3 }
   0xf   :  { %146 = shalt.err (!%p143_p7)
}
  0x10   :  { %s174_s16 = smov 128   ;;  %s175_s17 = smov 8  }
  0x11   :  { %25 = dma.hbm_to_vmem [thread:$0]  %s211_s0, 256, %s20_s7, [#allocation3], %s174_s16, %s174_s16, %s175_s17  }
  0x12   :  { %169 = dma.done.wait [#allocation3], 256  }
  0x13   :  { %170 = vsyncadd [#allocation3], 4294967040  ;;  %v41_v0 = vld [vmem:[#allocation2] sm:$0xff]  ;;  %v42_v1 = vld [vmem:[#allocation2 + $0x8] sm:$0xff]  ;;  %s176_s0 = smov [#allocation5]  }
  0x14   :  { %v45_v2 = vmin.f32 %v41_v0, 20.0  ;;  %v46_v3 = vmin.f32 %v42_v1, 20.0  ;;  %vm43_vm1 = vcmp.gt.f32.partialorder %v41_v0, 20.0  ;;  %vm44_vm3 = vcmp.gt.f32.partialorder %v42_v1, 20.0  ;;  %s101_s20 = sshll.u32 %s176_s0, 4  ;;  %s102_s20 = int_to_ptr.vmem [resolvable:$true] %s101_s20 }
  0x15   :  { %s147_s21 = scalar_lea.vmem %s102_s20, 128  ;;  %p152_p9 = scmp.lt.s32.totalorder %s102_s20, %s102_s20 }
  0x16   :  { %v47_v4 = vmul.f32 1.442695, %v45_v2  ;;  %v49_v5 = vmul.f32 1.442695, %v46_v3  ;;  %p148_p8 = scmp.ne.s32.totalorder %s102_s20, %s147_s21  ;;  %p153_p10 = scmp.lt.s32.totalorder %s147_s21, %s147_s21 }
  0x18   :  { %117 = vpow2.f32 %v47_v4  ;;  %p154_p11 = por %p153_p10, %p152_p9 }
  0x19   :  { %119 = vpow2.f32 %v49_v5 }
  0x1a   :  { %p155_p12 = pnand %p154_p11, %p148_p8 }
  0x22   :  { %v118_v6 = vpop.eup %117 }
  0x23   :  { %v120_v7 = vpop.eup %119  ;;  %v51_v8 = vadd.f32 1.0, %v118_v6  ;;  %v54_v10 = vmul.f32 -0.5, %v118_v6  ;;  %v57_v13 = vand.u32 2147483647, %v118_v6 }
  0x24   :  { %v60_v9 = vadd.f32 1.0, %v120_v7  ;;  %v63_v11 = vmul.f32 -0.5, %v120_v7  ;;  %v66_v15 = vand.u32 2147483647, %v120_v7 }
  0x25   :  { %121 = vlog2.f32 %v51_v8  ;;  %v55_v12 = vadd.f32 1.0, %v54_v10  ;;  %vm58_vm0 = vcmp.lt.f32.partialorder %v57_v13, 0.0004427343 }
  0x26   :  { %123 = vlog2.f32 %v60_v9  ;;  %v64_v14 = vadd.f32 1.0, %v63_v11  ;;  %vm67_vm2 = vcmp.lt.f32.partialorder %v66_v15, 0.0004427343 }
  0x27   :  { %v56_v16 = vmul.f32 %v118_v6, %v55_v12 }
  0x28   :  { %v65_v18 = vmul.f32 %v120_v7, %v64_v14 }
  0x2f   :  { %v122_v17 = vpop.eup %121 }
  0x30   :  { %v124_v19 = vpop.eup %123  ;;  %v53_v20 = vmul.f32 0.6931472, %v122_v17 }
  0x31   :  { %v62_v21 = vmul.f32 0.6931472, %v124_v19 }
  0x32   :  { %v59_v22 = vsel %vm58_vm0, %v56_v16, %v53_v20 }
  0x33   :  { %v68_v23 = vsel %vm67_vm2, %v65_v18, %v62_v21  ;;  %v69_v24 = vsel %vm43_vm1, %v41_v0, %v59_v22 }
  0x34   :  { %v70_v25 = vsel %vm44_vm3, %v42_v1, %v68_v23 }
  0x35   :  { %v76_v26 = vadd.f32 %v70_v25, %v69_v24 }
  0x37   :  { %78 = vst [vmem:[#allocation5] sm:$0xff] %v76_v26 }
  0x38   :  { %158 = shalt.err (!%p155_p12)
}
  0x39   :  { %s159_s24 = scalar_lea.hbm %s212_s1, 128 }
  0x3a   :  { %p160_p13 = scmp.ne.s32.totalorder %s212_s1, %s159_s24  ;;  %p163_p0 = scmp.lt.u32.totalorder %s159_s24, %s212_s1 }
  0x3c   :  { %p165_p1 = pnand %p163_p0, %p160_p13 }
  0x3e   :  { %168 = shalt.err (!%p165_p1)
}
  0x3f   :  { %104 = dma.vmem_to_hbm [thread:$0]  %s102_s20, 128, %s212_s1, [#allocation4]  }
  0x40   :  { %171 = dma.done.wait [#allocation4], 128  }
  0x41   :  { %172 = vsyncadd [#allocation4], 4294967168 }
  0x42   :  { %108 = vsyncpa [#allocation3], 1 }
  0x43   :  { %109 = vsyncpa [#allocation4], 1 }

</bundles_post_ra>
